<compile_context>
chip_gen: v7x
topology: tpu7x:2x2x1
jax: 0.10.0
libtpu: 0.0.40
codegen_flags: <defaults>
</compile_context>

<pallas_src>
import jax
import jax.numpy as jnp
from jax.experimental import pallas as pl
from jax.experimental.pallas import tpu as pltpu

# ---- synthetic field dimensions (small, consistent with the module) ----
DIN = 3          # (x, y, z)
HID = 32         # hidden width of each MLP
GEO = 16         # raw density-head width (only channel 0 -> density)
FEAT = 32        # feature dimension of the distilled feature field
TM_MAX = 4096    # max rows (points) per grid step
TM_MIN = 512     # keep >=4 grid steps before shrinking below this


def _field_adapter_kernel(ptsT_ref, w1T_ref, b1T_ref, wf2T_ref, bf2T_ref,
                          w2dT_ref, b2d_ref, dens_ref, feat_ref):
    """One tile of TM points, computed channels-first (lane axis = points).

    ptsT_ref : (3, TM)      coordinate-major world points (affine folded in w1/b1)
    w1T_ref  : (2*HID, 3)   fused first layer, transposed ([density | feature] rows)
    b1T_ref  : (2*HID, 1)
    wf2T_ref : (FEAT, HID)  feature head, transposed
    bf2T_ref : (FEAT, 1)
    w2dT_ref : (1, HID)     density head (single used column of the GEO head)
    b2d_ref  : (1, 1)
    dens_ref : (TM, 1)      trunc_exp(density logit)
    feat_ref : (TM, FEAT)
    """
    ptsT = ptsT_ref[...]                           # (3, TM)  lane-dense
    w1T = w1T_ref[...]                             # (2*HID, 3)

    # Layer 1 (K=3) as broadcast outer products on the VPU: w1T columns are
    # TM-independent lane broadcasts; point rows broadcast along sublanes.
    # Keeping the hidden transposed (2*HID, TM) makes every VPU op lane-dense.
    hT = (w1T[:, 0:1] * ptsT[0:1, :]
          + w1T[:, 1:2] * ptsT[1:2, :]
          + w1T[:, 2:3] * ptsT[2:3, :]
          + b1T_ref[...])
    hT = jnp.maximum(hT, 0.0)                      # (2*HID, TM)

    h_den = hT[:HID, :]                            # (HID, TM)  aligned vreg subset
    h_feat = hT[HID:, :]                           # (HID, TM)  aligned vreg subset

    # Density head on the MXU; trunc_exp only on the lane-dense (1, TM) row.
    # The min(.,15) clamp also guards ragged-tail garbage rows against inf/NaN.
    densT = jnp.dot(w2dT_ref[...], h_den,
                    preferred_element_type=jnp.float32) + b2d_ref[...]
    densT = jnp.exp(jnp.minimum(densT, 15.0))      # (1, TM)

    # Feature head on the MXU: (FEAT,HID) @ (HID,TM) -> lane-dense (FEAT, TM).
    featT = jnp.dot(wf2T_ref[...], h_feat,
                    preferred_element_type=jnp.float32) + bf2T_ref[...]

    # XLU transposes back to row-major so the HBM outputs need no wrapper copy.
    dens_ref[...] = jnp.transpose(densT)           # (TM, 1)
    feat_ref[...] = jnp.transpose(featT)           # (TM, FEAT)


def _choose_tm(m):
    """Large tiles to amortize the ~0.35us per-step overhead, while keeping
    >=4 grid steps (so both v7x TensorCores get pipelined work).  Tiny inputs
    run as a single step without inflation."""
    if m <= TM_MIN:
        return m
    tm = TM_MAX
    while tm > TM_MIN and (m + tm - 1) // tm < 4:
        tm //= 2
    return tm


def _pack_params(p):
    """Fold world->nerf affine into layer 1, fuse both MLPs' first layers and
    pre-transpose everything for the channels-first kernel layout."""
    f32 = jnp.float32
    R = p["R"].astype(f32)                                   # (3, 3)
    t = p["t"].astype(f32)                                   # (1, 3)

    # Fused layer 1 with the affine folded in: W1' = R @ W1, b1' = t @ W1 + b1.
    w1 = jnp.concatenate([R @ p["w1"], R @ p["wf1"]], axis=1)                       # (3, 64)
    b1 = jnp.concatenate([t @ p["w1"] + p["b1"], t @ p["wf1"] + p["bf1"]], axis=1)  # (1, 64)

    w1T = w1.T.astype(f32)                                   # (2*HID, 3)
    b1T = b1.T.astype(f32)                                   # (2*HID, 1)
    wf2T = p["wf2"].T.astype(f32)                            # (FEAT, HID)
    bf2T = p["bf2"].T.astype(f32)                            # (FEAT, 1)
    w2dT = p["w2"][:, 0:1].T.astype(f32)                     # (1, HID)  density column only
    b2d = p["b2"][:, 0:1].astype(f32)                        # (1, 1)
    return w1T, b1T, wf2T, bf2T, w2dT, b2d


@jax.jit
def feature_field_adapter_forward(world_points, params):
    """world_points: (*b, n, 3) -> {'density': (*b,n,1), 'feature': (*b,n,FEAT)}"""
    *batch_dims, n, _ = world_points.shape
    lead = tuple(batch_dims) + (n,)
    m = 1
    for d in lead:
        m *= d

    # Coordinate-major points: 3 contiguous rows of 4*m bytes each in HBM.
    ptsT = jnp.asarray(world_points, jnp.float32).reshape(m, DIN).T   # (3, m)
    w1T, b1T, wf2T, bf2T, w2dT, b2d = _pack_params(params)

    tm = _choose_tm(m)
    grid = ((m + tm - 1) // tm,)                   # ragged tail handled by Pallas

    dens, feat = pl.pallas_call(
        _field_adapter_kernel,
        grid=grid,
        in_specs=[
            pl.BlockSpec((DIN, tm), lambda i: (0, i)),          # points, coordinate-major
            pl.BlockSpec((2 * HID, DIN), lambda i: (0, 0)),     # fused W1^T
            pl.BlockSpec((2 * HID, 1), lambda i: (0, 0)),       # fused b1^T
            pl.BlockSpec((FEAT, HID), lambda i: (0, 0)),        # feature head W^T
            pl.BlockSpec((FEAT, 1), lambda i: (0, 0)),          # feature head b^T
            pl.BlockSpec((1, HID), lambda i: (0, 0)),           # density head W^T
            pl.BlockSpec((1, 1), lambda i: (0, 0)),             # density head b
        ],
        out_specs=[
            pl.BlockSpec((tm, 1), lambda i: (i, 0)),            # density, row-major
            pl.BlockSpec((tm, FEAT), lambda i: (i, 0)),         # feature, row-major
        ],
        out_shape=(
            jax.ShapeDtypeStruct((m, 1), jnp.float32),
            jax.ShapeDtypeStruct((m, FEAT), jnp.float32),
        ),
        compiler_params=pltpu.CompilerParams(
            dimension_semantics=("parallel",),
            vmem_limit_bytes=32 * 1024 * 1024,
        ),
    )(ptsT, w1T, b1T, wf2T, bf2T, w2dT, b2d)

    # Pure leading-dim reshapes only -- no slicing, no extra HBM round trip.
    return {"density": dens.reshape(*lead, 1), "feature": feat.reshape(*lead, FEAT)}


def make_params(key):
    """Deterministic synthetic weights (the real module loads a trained field)."""
    ks = jax.random.split(key, 10)

    # world_to_nerf affine: rotation-ish 3x3 + translation (row-vector convention)
    R = jnp.eye(DIN) + 0.05 * jax.random.normal(ks[0], (DIN, DIN))
    t = (0.1 * jax.random.normal(ks[1], (DIN,))).reshape(1, DIN)

    def lin(k, fan_in, shape):
        return jax.random.normal(k, shape) * (1.0 / jnp.sqrt(fan_in))

    # density MLP (rgb_field.get_density)
    w1 = lin(ks[2], DIN, (DIN, HID))
    b1 = 0.01 * jax.random.normal(ks[3], (1, HID))
    w2 = lin(ks[4], HID, (HID, GEO))
    b2 = 0.01 * jax.random.normal(ks[5], (1, GEO))

    # feature field MLP
    wf1 = lin(ks[6], DIN, (DIN, HID))
    bf1 = 0.01 * jax.random.normal(ks[7], (1, HID))
    wf2 = lin(ks[8], HID, (HID, FEAT))
    bf2 = 0.01 * jax.random.normal(ks[9], (1, FEAT))

    return {
        "R": R, "t": t,
        "w1": w1, "b1": b1, "w2": w2, "b2": b2,
        "wf1": wf1, "bf1": bf1, "wf2": wf2, "bf2": bf2,
    }


def _reference_forward(world_points, p):
    """Pure-JAX reference of the same synthetic forward, for correctness."""
    *lead, n, _ = world_points.shape
    pts = world_points.reshape(-1, DIN)
    nerf = pts @ p["R"] + p["t"][0]
    h = jnp.maximum(nerf @ p["w1"] + p["b1"], 0.0)
    raw = h @ p["w2"] + p["b2"]
    density = jnp.exp(jnp.minimum(raw[:, 0:1], 15.0))     # trunc_exp (fwd-clamped)
    hf = jnp.maximum(nerf @ p["wf1"] + p["bf1"], 0.0)
    feat = hf @ p["wf2"] + p["bf2"]
    return {
        "density": density.reshape(*lead, n, 1),
        "feature": feat.reshape(*lead, n, FEAT),
    }


if __name__ == "__main__":
    key = jax.random.PRNGKey(0)
    k_pts, k_par, k_big = jax.random.split(key, 3)
    params = make_params(k_par)

    # (*b, n, 3) world-frame query points: batch=2, n=96 points per batch
    world_points = jax.random.uniform(
        k_pts, (2, 96, DIN), dtype=jnp.float32, minval=-1.0, maxval=1.0
    )
    out = feature_field_adapter_forward(world_points, params)
    jax.block_until_ready(out)

    assert out["density"].shape == (2, 96, 1)
    assert out["feature"].shape == (2, 96, FEAT)
    ref = _reference_forward(world_points, params)
    assert jnp.allclose(out["density"], ref["density"], atol=2e-4, rtol=2e-4)
    assert jnp.allclose(out["feature"], ref["feature"], atol=2e-4, rtol=2e-4)

    # Second shape exercising the multi-tile path with a ragged tail.
    big_points = jax.random.uniform(
        k_big, (1, 1000, DIN), dtype=jnp.float32, minval=-1.0, maxval=1.0
    )
    out2 = feature_field_adapter_forward(big_points, params)
    jax.block_until_ready(out2)
    ref2 = _reference_forward(big_points, params)
    assert jnp.allclose(out2["density"], ref2["density"], atol=2e-4, rtol=2e-4)
    assert jnp.allclose(out2["feature"], ref2["feature"], atol=2e-4, rtol=2e-4)

    print("KERNEL_OK")
</pallas_src>

<mosaic_0001>
module attributes {stable_mosaic.version = 11 : i64} {
  func.func @_field_adapter_kernel(%arg0: i32, %arg1: memref<3x192xf32, #tpu.memory_space<vmem>>, %arg2: memref<64x3xf32, #tpu.memory_space<vmem>>, %arg3: memref<64x1xf32, #tpu.memory_space<vmem>>, %arg4: memref<32x32xf32, #tpu.memory_space<vmem>>, %arg5: memref<32x1xf32, #tpu.memory_space<vmem>>, %arg6: memref<1x32xf32, #tpu.memory_space<vmem>>, %arg7: memref<1x1xf32, #tpu.memory_space<vmem>>, %arg8: memref<192x1xf32, #tpu.memory_space<vmem>>, %arg9: memref<192x32xf32, #tpu.memory_space<vmem>>) attributes {dimension_semantics = [#tpu.dimension_semantics<parallel>], iteration_bounds = array<i64: 1>, scalar_prefetch = 0 : i64, scratch_operands = 0 : i64, tpu.core_type = #tpu.core_type<tc>, window_params = [{transform_indices = @transform_0, window_bounds = array<i64: 3, 192>}, {pipeline_mode = #tpu.pipeline_mode<synchronous>, transform_indices = @transform_1, window_bounds = array<i64: 64, 3>}, {pipeline_mode = #tpu.pipeline_mode<synchronous>, transform_indices = @transform_2, window_bounds = array<i64: 64, 1>}, {pipeline_mode = #tpu.pipeline_mode<synchronous>, transform_indices = @transform_3, window_bounds = array<i64: 32, 32>}, {pipeline_mode = #tpu.pipeline_mode<synchronous>, transform_indices = @transform_4, window_bounds = array<i64: 32, 1>}, {pipeline_mode = #tpu.pipeline_mode<synchronous>, transform_indices = @transform_5, window_bounds = array<i64: 1, 32>}, {pipeline_mode = #tpu.pipeline_mode<synchronous>, transform_indices = @transform_6, window_bounds = array<i64: 1, 1>}, {transform_indices = @transform_7, window_bounds = array<i64: 192, 1>}, {transform_indices = @transform_8, window_bounds = array<i64: 192, 32>}]} {
    %c0 = arith.constant 0 : index
    %c0_0 = arith.constant 0 : index
    %0 = vector.load %arg1[%c0, %c0_0] : memref<3x192xf32, #tpu.memory_space<vmem>>, vector<3x192xf32>
    %c0_1 = arith.constant 0 : index
    %c0_2 = arith.constant 0 : index
    %1 = vector.load %arg2[%c0_1, %c0_2] : memref<64x3xf32, #tpu.memory_space<vmem>>, vector<64x3xf32>
    %2 = vector.extract_strided_slice %1 {offsets = [0, 0], sizes = [64, 1], strides = [1, 1]} : vector<64x3xf32> to vector<64x1xf32>
    %3 = vector.extract_strided_slice %0 {offsets = [0, 0], sizes = [1, 192], strides = [1, 1]} : vector<3x192xf32> to vector<1x192xf32>
    %4 = vector.broadcast %2 : vector<64x1xf32> to vector<64x192xf32>
    %5 = vector.broadcast %3 : vector<1x192xf32> to vector<64x192xf32>
    %6 = arith.mulf %4, %5 : vector<64x192xf32>
    %7 = vector.extract_strided_slice %1 {offsets = [0, 1], sizes = [64, 1], strides = [1, 1]} : vector<64x3xf32> to vector<64x1xf32>
    %8 = vector.extract_strided_slice %0 {offsets = [1, 0], sizes = [1, 192], strides = [1, 1]} : vector<3x192xf32> to vector<1x192xf32>
    %9 = vector.broadcast %7 : vector<64x1xf32> to vector<64x192xf32>
    %10 = vector.broadcast %8 : vector<1x192xf32> to vector<64x192xf32>
    %11 = arith.mulf %9, %10 : vector<64x192xf32>
    %12 = arith.addf %6, %11 : vector<64x192xf32>
    %13 = vector.extract_strided_slice %1 {offsets = [0, 2], sizes = [64, 1], strides = [1, 1]} : vector<64x3xf32> to vector<64x1xf32>
    %14 = vector.extract_strided_slice %0 {offsets = [2, 0], sizes = [1, 192], strides = [1, 1]} : vector<3x192xf32> to vector<1x192xf32>
    %15 = vector.broadcast %13 : vector<64x1xf32> to vector<64x192xf32>
    %16 = vector.broadcast %14 : vector<1x192xf32> to vector<64x192xf32>
    %17 = arith.mulf %15, %16 : vector<64x192xf32>
    %18 = arith.addf %12, %17 : vector<64x192xf32>
    %c0_3 = arith.constant 0 : index
    %c0_4 = arith.constant 0 : index
    %19 = vector.load %arg3[%c0_3, %c0_4] : memref<64x1xf32, #tpu.memory_space<vmem>>, vector<64x1xf32>
    %20 = vector.broadcast %19 : vector<64x1xf32> to vector<64x192xf32>
    %21 = arith.addf %18, %20 : vector<64x192xf32>
    %cst = arith.constant 0.000000e+00 : f32
    %22 = vector.broadcast %cst : f32 to vector<64x192xf32>
    %23 = arith.maximumf %21, %22 : vector<64x192xf32>
    %24 = vector.extract_strided_slice %23 {offsets = [0, 0], sizes = [32, 192], strides = [1, 1]} : vector<64x192xf32> to vector<32x192xf32>
    %25 = vector.extract_strided_slice %23 {offsets = [32, 0], sizes = [32, 192], strides = [1, 1]} : vector<64x192xf32> to vector<32x192xf32>
    %c0_5 = arith.constant 0 : index
    %c0_6 = arith.constant 0 : index
    %26 = vector.load %arg6[%c0_5, %c0_6] : memref<1x32xf32, #tpu.memory_space<vmem>>, vector<1x32xf32>
    %cst_7 = arith.constant dense<0.000000e+00> : vector<1x192xf32>
    %27 = tpu.matmul %26, %24, %cst_7 {dimension_numbers = #tpu.dot_dimension_numbers<[1], [0], [0], [1], [0, 0, 1, 1], [], []>} : vector<1x32xf32>, vector<32x192xf32>, vector<1x192xf32> -> vector<1x192xf32>
    %c0_8 = arith.constant 0 : index
    %c0_9 = arith.constant 0 : index
    %28 = vector.load %arg7[%c0_8, %c0_9] : memref<1x1xf32, #tpu.memory_space<vmem>>, vector<1x1xf32>
    %29 = vector.broadcast %28 : vector<1x1xf32> to vector<1x192xf32>
    %30 = arith.addf %27, %29 : vector<1x192xf32>
    %cst_10 = arith.constant 1.500000e+01 : f32
    %31 = vector.broadcast %cst_10 : f32 to vector<1x192xf32>
    %32 = arith.minimumf %30, %31 : vector<1x192xf32>
    %33 = math.exp %32 : vector<1x192xf32>
    %c0_11 = arith.constant 0 : index
    %c0_12 = arith.constant 0 : index
    %34 = vector.load %arg4[%c0_11, %c0_12] : memref<32x32xf32, #tpu.memory_space<vmem>>, vector<32x32xf32>
    %cst_13 = arith.constant dense<0.000000e+00> : vector<32x192xf32>
    %35 = tpu.matmul %34, %25, %cst_13 {dimension_numbers = #tpu.dot_dimension_numbers<[1], [0], [0], [1], [0, 0, 1, 1], [], []>} : vector<32x32xf32>, vector<32x192xf32>, vector<32x192xf32> -> vector<32x192xf32>
    %c0_14 = arith.constant 0 : index
    %c0_15 = arith.constant 0 : index
    %36 = vector.load %arg5[%c0_14, %c0_15] : memref<32x1xf32, #tpu.memory_space<vmem>>, vector<32x1xf32>
    %37 = vector.broadcast %36 : vector<32x1xf32> to vector<32x192xf32>
    %38 = arith.addf %35, %37 : vector<32x192xf32>
    %39 = tpu.transpose %33, [1, 0] : vector<1x192xf32> -> vector<192x1xf32>
    %c0_16 = arith.constant 0 : index
    %c0_17 = arith.constant 0 : index
    %40 = vector.load %arg8[%c0_16, %c0_17] : memref<192x1xf32, #tpu.memory_space<vmem>>, vector<192x1xf32>
    tpu.vector_store %arg8[%c0_16, %c0_17], %39 {strides = array<i32>} : memref<192x1xf32, #tpu.memory_space<vmem>>, vector<192x1xf32>,
    %41 = tpu.transpose %38, [1, 0] : vector<32x192xf32> -> vector<192x32xf32>
    %c0_18 = arith.constant 0 : index
    %c0_19 = arith.constant 0 : index
    %42 = vector.load %arg9[%c0_18, %c0_19] : memref<192x32xf32, #tpu.memory_space<vmem>>, vector<192x32xf32>
    tpu.vector_store %arg9[%c0_18, %c0_19], %41 {strides = array<i32>} : memref<192x32xf32, #tpu.memory_space<vmem>>, vector<192x32xf32>,
    return
  }
  func.func @transform_0(%arg0: i32) -> (i32, i32) {
    %c0_i32 = arith.constant 0 : i32
    %c0_i32_0 = arith.constant 0 : i32
    return %c0_i32, %arg0 : i32, i32
  }
  func.func @transform_1(%arg0: i32) -> (i32, i32) {
    %c0_i32 = arith.constant 0 : i32
    %c0_i32_0 = arith.constant 0 : i32
    %c0_i32_1 = arith.constant 0 : i32
    return %c0_i32, %c0_i32_0 : i32, i32
  }
  func.func @transform_2(%arg0: i32) -> (i32, i32) {
    %c0_i32 = arith.constant 0 : i32
    %c0_i32_0 = arith.constant 0 : i32
    %c0_i32_1 = arith.constant 0 : i32
    return %c0_i32, %c0_i32_0 : i32, i32
  }
  func.func @transform_3(%arg0: i32) -> (i32, i32) {
    %c0_i32 = arith.constant 0 : i32
    %c0_i32_0 = arith.constant 0 : i32
    %c0_i32_1 = arith.constant 0 : i32
    return %c0_i32, %c0_i32_0 : i32, i32
  }
  func.func @transform_4(%arg0: i32) -> (i32, i32) {
    %c0_i32 = arith.constant 0 : i32
    %c0_i32_0 = arith.constant 0 : i32
    %c0_i32_1 = arith.constant 0 : i32
    return %c0_i32, %c0_i32_0 : i32, i32
  }
  func.func @transform_5(%arg0: i32) -> (i32, i32) {
    %c0_i32 = arith.constant 0 : i32
    %c0_i32_0 = arith.constant 0 : i32
    %c0_i32_1 = arith.constant 0 : i32
    return %c0_i32, %c0_i32_0 : i32, i32
  }
  func.func @transform_6(%arg0: i32) -> (i32, i32) {
    %c0_i32 = arith.constant 0 : i32
    %c0_i32_0 = arith.constant 0 : i32
    %c0_i32_1 = arith.constant 0 : i32
    return %c0_i32, %c0_i32_0 : i32, i32
  }
  func.func @transform_7(%arg0: i32) -> (i32, i32) {
    %c0_i32 = arith.constant 0 : i32
    %c0_i32_0 = arith.constant 0 : i32
    return %arg0, %c0_i32 : i32, i32
  }
  func.func @transform_8(%arg0: i32) -> (i32, i32) {
    %c0_i32 = arith.constant 0 : i32
    %c0_i32_0 = arith.constant 0 : i32
    return %arg0, %c0_i32 : i32, i32
  }
}

</mosaic_0001>

<bundles_post_ra>
// kernel: feature_field_adapter_forward.1
= control target key start
LH: loop header
LB: loop body
LE: loop exit
PB: predicated region body
PF: predicated region fallthrough
CT: control target
= control target key end

     0   :  { %v812_v0 = vmov 2   ;;  %v813_v1 = vmov 1   ;;  %v814_v8 = vmov 0   ;;  %v815_v20 = vmov 0.0   ;;  %s1235_s1 = inlined_call_operand.vmem [shape: f32[64,3], index: 1, kind: input, shape index: {}]   ;;  %s1236_s6 = inlined_call_operand.<no memory space> [shape: f32[1,1], index: 6, kind: input, shape index: {}]   ;;  %s1237_s2 = inlined_call_operand.vmem [shape: f32[64,1], index: 2, kind: input, shape index: {}]   ;;  %s1238_s4 = inlined_call_operand.vmem [shape: f32[32,1], index: 4, kind: input, shape index: {}]   ;;  %s1239_s0 = inlined_call_operand.vmem [shape: f32[3,192], index: 0, kind: input, shape index: {}]   ;;  %s1240_s5 = inlined_call_operand.vmem [shape: f32[1,32], index: 5, kind: input, shape index: {}]   ;;  %s1241_s3 = inlined_call_operand.vmem [shape: f32[32,32], index: 3, kind: input, shape index: {}]   ;;  %s1242_s7 = inlined_call_operand.vmem [shape: f32[192,1], index: 7, kind: output, shape index: {0}]   ;;  %s1243_s8 = inlined_call_operand.vmem [shape: f32[192,32], index: 8, kind: output, shape index: {1}]  }
   0x1   :  { %794 = vset.pattern.permute.xlu0 %v812_v0  ;;  %793 = vset.pattern.permute.xlu1 %v813_v1  ;;  %v31_v2 = vld [vmem:[%s1235_s1] sm:$0xff]  ;;  %v14_v3 = vstv %s1236_s6  ;;  %v33_v4 = vld [vmem:[%s1235_s1 + $0x10] sm:$0xff]  ;;  %v32_v5 = vld [vmem:[%s1235_s1 + $0x8] sm:$0xff]  ;;  %v80_v30 = vlaneseq  ;;  %vm369_vm0 = vcmask 261120   ;;  %vm643_vm1 = vcmask 7168  }
   0x2   :  { %197 = vperm.xlu0 %794, %v31_v2   ;;  %115 = vperm.xlu1 %793, %v31_v2   ;;  %15 = vst [vmem:[#allocation2] sm:$0x1] %v14_v3  ;;  %v36_v6 = vld [vmem:[%s1235_s1 + $0x28] sm:$0xff]  ;;  %v35_v7 = vld [vmem:[%s1235_s1 + $0x20] sm:$0xff]  ;;  %v38_v9 = vld [vmem:[%s1235_s1 + $0x38] sm:$0xff] }
   0x3   :  { %v34_v10 = vld [vmem:[%s1235_s1 + $0x18] sm:$0xff]  ;;  %v278_v11 = vld [vmem:[%s1237_s2] sm:$0xff]  ;;  %v279_v12 = vld [vmem:[%s1237_s2 + $0x8] sm:$0xff]  ;;  %437 = vmatprep.mubr.f32.mxu0 %v815_v20  ;;  %560 = vmatprep.mubr.f32.mxu1 %v815_v20  ;;  %v81_v33 = vshrl.u32 %v80_v30, 7 }
   0x4   :  { %v37_v13 = vld [vmem:[%s1235_s1 + $0x30] sm:$0xff]  ;;  %v282_v14 = vld [vmem:[%s1237_s2 + $0x20] sm:$0xff]  ;;  %v285_v15 = vld [vmem:[%s1237_s2 + $0x38] sm:$0xff] }
   0x5   :  { %v454_v16 = vld [vmem:[%s1238_s4] sm:$0xff]  ;;  %v456_v17 = vld [vmem:[%s1238_s4 + $0x10] sm:$0xff]  ;;  %v281_v19 = vld [vmem:[%s1237_s2 + $0x18] sm:$0xff]  ;;  %v148_v35 = vsub.s32 1, %v81_v33  ;;  %v152_v36 = vsub.s32 5, %v81_v33  ;;  %v937_v37 = vsub.s32 0, %v81_v33 }
   0x6   :  { %205 = vperm.xlu0 %794, %v33_v4   ;;  %119 = vperm.xlu1 %793, %v32_v5   ;;  %v280_v18 = vld [vmem:[%s1237_s2 + $0x10] sm:$0xff]  ;;  %v283_v21 = vld [vmem:[%s1237_s2 + $0x28] sm:$0xff]  ;;  %v457_v25 = vld [vmem:[%s1238_s4 + $0x18] sm:$0xff]  ;;  %v86_v38 = vsub.s32 4, %v81_v33  ;;  %v230_v41 = vsub.s32 2, %v81_v33  ;;  %v234_v42 = vsub.s32 6, %v81_v33 }
   0x7   :  { %v284_v22 = vld [vmem:[%s1237_s2 + $0x30] sm:$0xff]  ;;  %v455_v24 = vld [vmem:[%s1238_s4 + $0x8] sm:$0xff]  ;;  %v30_v40 = vld [vmem:[%s1239_s0] sm:$0x77] }
   0x8   :  { %v149_v44 = vrot.slane %v30_v40, %v148_v35  ;;  %v153_v45 = vrot.slane %v30_v40, %v152_v36  ;;  %v83_v46 = vrot.slane %v30_v40, %v937_v37  ;;  %v87_v47 = vrot.slane %v30_v40, %v86_v38 }
   0x9   :  { %v359_v23 = vld [vmem:[#allocation2] sm:$0x1]  ;;  %v231_v49 = vrot.slane %v30_v40, %v230_v41  ;;  %v235_v50 = vrot.slane %v30_v40, %v234_v42 }
   0xa   :  { %217 = vperm.xlu0 %794, %v36_v6   ;;  %795 = vset.pattern.permute.xlu1 %v812_v0  ;;  %v947_v51 = vrot.slane %v149_v44, %v148_v35  ;;  %v949_v52 = vrot.slane %v153_v45, %v148_v35  ;;  %v952_v53 = vrot.slane %v83_v46, %v937_v37 }
   0xb   :  { %201 = vperm.xlu1 %795, %v32_v5   ;;  %v955_v54 = vrot.slane %v87_v47, %v937_v37  ;;  %v961_v61 = vrot.slane %v231_v49, %v230_v41  ;;  %v963_v62 = vrot.slane %v235_v50, %v230_v41 }
   0xe   :  { %802 = vset.pattern.permute.xlu0 %v813_v1 }
   0xf   :  { %131 = vperm.xlu0 %802, %v35_v7   ;;  %796 = vset.pattern.permute.xlu1 %v814_v8 }
  0x10   :  { %51 = vperm.xlu1 %796, %v33_v4  }
  0x13   :  { %143 = vperm.xlu0 %802, %v38_v9  }
  0x14   :  { %797 = vset.pattern.permute.xlu1 %v813_v1 }
  0x15   :  { %123 = vperm.xlu1 %797, %v33_v4  }
  0x17   :  { %805 = vset.pattern.permute.xlu0 %v814_v8 }
  0x18   :  { %41 = vperm.xlu0 %805, %v31_v2  }
  0x19   :  { %127 = vperm.xlu1 %797, %v34_v10  }
  0x1c   :  { %46 = vperm.xlu0 %805, %v32_v5  }
  0x1d   :  { %798 = vset.pattern.permute.xlu1 %v812_v0 }
  0x1e   :  { %209 = vperm.xlu1 %798, %v34_v10  }
  0x20   :  { %56 = vperm.xlu0 %805, %v34_v10  }
  0x22   :  { %799 = vset.pattern.permute.xlu1 %v814_v8 }
  0x23   :  { %288 = vperm.xlu1 %799, %v278_v11  }
  0x24   :  { %293 = vperm.xlu0 %805, %v279_v12  }
  0x27   :  { %61 = vperm.xlu1 %799, %v35_v7  }
  0x28   :  { %71 = vperm.xlu0 %805, %v37_v13  }
  0x2b   :  { %66 = vperm.xlu1 %799, %v36_v6  }
  0x2c   :  { %308 = vperm.xlu0 %805, %v282_v14  }
  0x2f   :  { %800 = vset.pattern.permute.xlu1 %v813_v1 }
  0x30   :  { %323 = vperm.xlu0 %805, %v285_v15   ;;  %135 = vperm.xlu1 %800, %v36_v6  }
  0x34   :  { %460 = vperm.xlu0 %805, %v454_v16   ;;  %801 = vset.pattern.permute.xlu1 %v812_v0 }
  0x35   :  { %213 = vperm.xlu1 %801, %v35_v7  }
  0x38   :  { %470 = vperm.xlu0 %805, %v456_v17  }
  0x39   :  { %803 = vset.pattern.permute.xlu1 %v814_v8 }
  0x3a   :  { %298 = vperm.xlu1 %803, %v280_v18  }
  0x3e   :  { %303 = vperm.xlu1 %803, %v281_v19  }
  0x42   :  { %76 = vperm.xlu1 %803, %v38_v9  }
  0x46   :  { %804 = vset.pattern.permute.xlu1 %v813_v1 }
  0x47   :  { %139 = vperm.xlu1 %804, %v37_v13  }
  0x4b   :  { %806 = vset.pattern.permute.xlu1 %v812_v0 }
  0x4c   :  { %221 = vperm.xlu1 %806, %v37_v13  }
  0x50   :  { %225 = vperm.xlu1 %806, %v38_v9  }
  0x54   :  { %807 = vset.pattern.permute.xlu1 %v814_v8 }
  0x55   :  { %313 = vperm.xlu1 %807, %v283_v21  }
  0x59   :  { %318 = vperm.xlu1 %807, %v284_v22  }
  0x5d   :  { %362 = vperm.xlu1 %807, %v359_v23  }
  0x61   :  { %465 = vperm.xlu1 %807, %v455_v24  }
  0x65   :  { %475 = vperm.xlu1 %807, %v457_v25  }
  0x81   :  { %v116_v26 = vpop.permute.xlu1 %115  ;;  %v198_v27 = vpop.permute.xlu0 %197 }
  0x82   :  { %v164_v59 = vmul.f32 %v947_v51, %v116_v26  ;;  %v165_v60 = vmul.f32 %v949_v52, %v116_v26  ;;  %v246_v9 = vmul.f32 %v961_v61, %v198_v27  ;;  %v247_v10 = vmul.f32 %v963_v62, %v198_v27 }
  0x85   :  { %v120_v28 = vpop.permute.xlu1 %119  ;;  %v931_v29 = vpop.permute.xlu0 %205 }
  0x86   :  { %v166_v0 = vmul.f32 %v947_v51, %v120_v28  ;;  %v167_v1 = vmul.f32 %v949_v52, %v120_v28  ;;  %v250_v47 = vmul.f32 %v961_v61, %v931_v29  ;;  %v251_v49 = vmul.f32 %v963_v62, %v931_v29 }
  0x89   :  { %v933_v31 = vpop.permute.xlu0 %217 }
  0x8a   :  { %v202_v32 = vpop.permute.xlu1 %201 }
  0x8b   :  { %v248_v12 = vmul.f32 %v961_v61, %v202_v32  ;;  %v249_v13 = vmul.f32 %v963_v62, %v202_v32 }
  0x8e   :  { %v935_v34 = vpop.permute.xlu0 %131 }
  0x8f   :  { %v939_v39 = vpop.permute.xlu1 %51 }
  0x90   :  { %v102_v41 = vmul.f32 %v952_v53, %v939_v39  ;;  %v103_v42 = vmul.f32 %v955_v54, %v939_v39 }
  0x92   :  { %v944_v43 = vpop.permute.xlu0 %143 }
  0x94   :  { %v124_v48 = vpop.permute.xlu1 %123 }
  0x95   :  { %v168_v38 = vmul.f32 %v947_v51, %v124_v48  ;;  %v169_v40 = vmul.f32 %v949_v52, %v124_v48 }
  0x97   :  { %v42_v55 = vpop.permute.xlu0 %41  ;;  %v184_v50 = vadd.f32 %v168_v38, %v102_v41  ;;  %v256_v38 = vmul.f32 %v961_v61, %v933_v31 }
  0x98   :  { %v128_v56 = vpop.permute.xlu1 %127  ;;  %v98_v57 = vmul.f32 %v952_v53, %v42_v55  ;;  %v99_v58 = vmul.f32 %v955_v54, %v42_v55  ;;  %v185_v55 = vadd.f32 %v169_v40, %v103_v42  ;;  %v257_v40 = vmul.f32 %v963_v62, %v933_v31 }
  0x99   :  { %v170_v48 = vmul.f32 %v947_v51, %v128_v56 }
  0x9a   :  { %v180_v4 = vadd.f32 %v164_v59, %v98_v57  ;;  %v181_v5 = vadd.f32 %v165_v60, %v99_v58  ;;  %v171_v57 = vmul.f32 %v949_v52, %v128_v56 }
  0x9b   :  { %v47_v63 = vpop.permute.xlu0 %46 }
  0x9c   :  { %v100_v2 = vmul.f32 %v952_v53, %v47_v63  ;;  %v101_v3 = vmul.f32 %v955_v54, %v47_v63  ;;  %v262_v14 = vadd.f32 %v246_v9, %v180_v4  ;;  %v263_v15 = vadd.f32 %v247_v10, %v181_v5 }
  0x9d   :  { %v210_v6 = vpop.permute.xlu1 %209 }
  0x9e   :  { %v182_v7 = vadd.f32 %v166_v0, %v100_v2  ;;  %v183_v8 = vadd.f32 %v167_v1, %v101_v3  ;;  %v252_v60 = vmul.f32 %v961_v61, %v210_v6  ;;  %v253_v63 = vmul.f32 %v963_v62, %v210_v6  ;;  %v358_v6 = vld [vmem:[%s1240_s5] sm:$0x1] }
  0x9f   :  { %v57_v11 = vpop.permute.xlu0 %56  ;;  %v266_v0 = vadd.f32 %v250_v47, %v184_v50  ;;  %v267_v1 = vadd.f32 %v251_v49, %v185_v55 }
  0xa0   :  { %v264_v17 = vadd.f32 %v248_v12, %v182_v7  ;;  %v265_v18 = vadd.f32 %v249_v13, %v183_v8  ;;  %v104_v44 = vmul.f32 %v952_v53, %v57_v11  ;;  %v105_v45 = vmul.f32 %v955_v54, %v57_v11 }
  0xa2   :  { %v289_v16 = vpop.permute.xlu1 %288  ;;  %v186_v58 = vadd.f32 %v170_v48, %v104_v44  ;;  %v187_v59 = vadd.f32 %v171_v57, %v105_v45  ;;  %v179_v44 = vmul.f32 %v949_v52, %v944_v43 }
  0xa3   :  { %v326_v19 = vadd.f32 %v289_v16, %v262_v14  ;;  %v327_v21 = vadd.f32 %v289_v16, %v263_v15  ;;  %v294_v22 = vpop.permute.xlu0 %293 }
  0xa4   :  { %v328_v23 = vadd.f32 %v294_v22, %v264_v17  ;;  %v329_v24 = vadd.f32 %v294_v22, %v265_v18  ;;  %v268_v4 = vadd.f32 %v252_v60, %v186_v58  ;;  %v269_v5 = vadd.f32 %v253_v63, %v187_v59 }
  0xa5   :  { %v342_v25 = vmax.f32 %v326_v19, 0.0  ;;  %v343_v26 = vmax.f32 %v327_v21, 0.0  ;;  %v172_v18 = vmul.f32 %v947_v51, %v935_v34  ;;  %v173_v19 = vmul.f32 %v949_v52, %v935_v34 }
  0xa6   :  { %v344_v28 = vmax.f32 %v328_v23, 0.0  ;;  %v62_v30 = vpop.permute.xlu1 %61  ;;  %v345_v27 = vmax.f32 %v329_v24, 0.0 }
  0xa7   :  { %v106_v16 = vmul.f32 %v952_v53, %v62_v30  ;;  %v107_v17 = vmul.f32 %v955_v54, %v62_v30  ;;  %v72_v21 = vpop.permute.xlu0 %71 }
  0xa8   :  { %v769_v33 = vpack.c.bf16 %v345_v27, %v343_v26  ;;  %v771_v35 = vpack.c.bf16 %v344_v28, %v342_v25  ;;  %v110_v48 = vmul.f32 %v952_v53, %v72_v21  ;;  %v111_v57 = vmul.f32 %v955_v54, %v72_v21 }
  0xa9   :  { %v188_v28 = vadd.f32 %v172_v18, %v106_v16  ;;  %v189_v30 = vadd.f32 %v173_v19, %v107_v17 }
  0xaa   :  { %v67_v36 = vpop.permute.xlu1 %66  ;;  %770 = vmatprep.subr.bf16.mxu0 %v769_v33 }
  0xab   :  { %772 = vmatpush1.bf16.msra.mxu0 %v771_v35  ;;  %v108_v27 = vmul.f32 %v952_v53, %v67_v36  ;;  %v109_v33 = vmul.f32 %v955_v54, %v67_v36  ;;  %v309_v47 = vpop.permute.xlu0 %308 }
  0xaf   :  { %v136_v32 = vpop.permute.xlu1 %135 }
  0xb0   :  { %v174_v24 = vmul.f32 %v947_v51, %v136_v32  ;;  %v175_v25 = vmul.f32 %v949_v52, %v136_v32  ;;  %v178_v32 = vmul.f32 %v947_v51, %v944_v43 }
  0xb2   :  { %v190_v45 = vadd.f32 %v174_v24, %v108_v27  ;;  %v191_v36 = vadd.f32 %v175_v25, %v109_v33  ;;  %v452_v24 = vld [vmem:[%s1241_s3 + $0x10] sm:$0xff]  ;;  %v453_v25 = vld [vmem:[%s1241_s3 + $0x18] sm:$0xff] }
  0xb4   :  { %v214_v46 = vpop.permute.xlu1 %213 }
  0xb5   :  { %v254_v22 = vmul.f32 %v961_v61, %v214_v46  ;;  %v255_v23 = vmul.f32 %v963_v62, %v214_v46 }
  0xb7   :  { %v270_v41 = vadd.f32 %v254_v22, %v188_v28  ;;  %v271_v42 = vadd.f32 %v255_v23, %v189_v30  ;;  %v450_v22 = vld [vmem:[%s1241_s3] sm:$0xff]  ;;  %v451_v23 = vld [vmem:[%s1241_s3 + $0x8] sm:$0xff] }
  0xb9   :  { %v299_v39 = vpop.permute.xlu1 %298  ;;  %v335_v43 = vadd.f32 %v309_v47, %v271_v42 }
  0xba   :  { %v330_v2 = vadd.f32 %v299_v39, %v266_v0  ;;  %v331_v3 = vadd.f32 %v299_v39, %v267_v1  ;;  %v334_v39 = vadd.f32 %v309_v47, %v270_v41  ;;  %v272_v1 = vadd.f32 %v256_v38, %v190_v45 }
  0xbc   :  { %v346_v9 = vmax.f32 %v330_v2, 0.0  ;;  %v347_v10 = vmax.f32 %v331_v3, 0.0 }
  0xbd   :  { %v304_v29 = vpop.permute.xlu1 %303 }
  0xbe   :  { %v332_v7 = vadd.f32 %v304_v29, %v268_v4  ;;  %v333_v8 = vadd.f32 %v304_v29, %v269_v5 }
  0xc0   :  { %v348_v11 = vmax.f32 %v332_v7, 0.0  ;;  %v349_v56 = vmax.f32 %v333_v8, 0.0  ;;  %v350_v7 = vmax.f32 %v334_v39, 0.0 }
  0xc1   :  { %v77_v12 = vpop.permute.xlu1 %76 }
  0xc2   :  { %v773_v13 = vpack.c.bf16 %v349_v56, %v347_v10  ;;  %v775_v14 = vpack.c.bf16 %v348_v11, %v346_v9  ;;  %v112_v35 = vmul.f32 %v952_v53, %v77_v12  ;;  %v113_v34 = vmul.f32 %v955_v54, %v77_v12  ;;  %v324_v53 = vpop.permute.xlu0 %323 }
  0xc3   :  { %v351_v9 = vmax.f32 %v335_v43, 0.0 }
  0xc4   :  { %774 = vmatprep.subr.bf16.mxu0 %v773_v13  ;;  %v194_v58 = vadd.f32 %v178_v32, %v112_v35  ;;  %v195_v59 = vadd.f32 %v179_v44, %v113_v34 }
  0xc5   :  { %776 = vmatpush1.bf16.msra.mxu0 %v775_v14 }
  0xc6   :  { %v140_v15 = vpop.permute.xlu1 %139 }
  0xc7   :  { %v176_v49 = vmul.f32 %v947_v51, %v140_v15  ;;  %v177_v50 = vmul.f32 %v949_v52, %v140_v15  ;;  %v273_v52 = vadd.f32 %v257_v40, %v191_v36 }
  0xc8   :  { %764 = vmatmul.mubr.msk.f32.vlgmr.msra.gmra.mrb[0].mxu0 %vm369_vm0, %v358_v6 }
  0xc9   :  { %554 = vmatprep.mubr.f32.mxu0 %v815_v20  ;;  %v192_v2 = vadd.f32 %v176_v49, %v110_v48  ;;  %v193_v3 = vadd.f32 %v177_v50, %v111_v57  ;;  %v461_v50 = vpop.permute.xlu0 %460 }
  0xcb   :  { %v222_v26 = vpop.permute.xlu1 %221 }
  0xcc   :  { %v258_v60 = vmul.f32 %v961_v61, %v222_v26  ;;  %v259_v63 = vmul.f32 %v963_v62, %v222_v26 }
  0xcd   :  { %v471_v57 = vpop.permute.xlu0 %470 }
  0xce   :  { %v274_v54 = vadd.f32 %v258_v60, %v192_v2  ;;  %v275_v8 = vadd.f32 %v259_v63, %v193_v3 }
  0xcf   :  { %v226_v46 = vpop.permute.xlu1 %225 }
  0xd0   :  { %v260_v55 = vmul.f32 %v961_v61, %v226_v46  ;;  %v261_v31 = vmul.f32 %v963_v62, %v226_v46 }
  0xd2   :  { %v276_v0 = vadd.f32 %v260_v55, %v194_v58  ;;  %v277_v51 = vadd.f32 %v261_v31, %v195_v59 }
  0xd4   :  { %v314_v4 = vpop.permute.xlu1 %313  ;;  %v340_v10 = vadd.f32 %v324_v53, %v276_v0  ;;  %v341_v11 = vadd.f32 %v324_v53, %v277_v51 }
  0xd5   :  { %v336_v5 = vadd.f32 %v314_v4, %v272_v1  ;;  %v337_v29 = vadd.f32 %v314_v4, %v273_v52 }
  0xd6   :  { %v356_v17 = vmax.f32 %v340_v10, 0.0  ;;  %v357_v18 = vmax.f32 %v341_v11, 0.0 }
  0xd7   :  { %v352_v56 = vmax.f32 %v336_v5, 0.0  ;;  %v353_v61 = vmax.f32 %v337_v29, 0.0 }
  0xd8   :  { %v319_v12 = vpop.permute.xlu1 %318 }
  0xd9   :  { %v779_v62 = vpack.c.bf16 %v352_v56, %v350_v7  ;;  %v338_v13 = vadd.f32 %v319_v12, %v274_v54  ;;  %v339_v14 = vadd.f32 %v319_v12, %v275_v8  ;;  %v777_v6 = vpack.c.bf16 %v353_v61, %v351_v9 }
  0xdb   :  { %v354_v15 = vmax.f32 %v338_v13, 0.0  ;;  %v355_v16 = vmax.f32 %v339_v14, 0.0  ;;  %778 = vmatprep.subr.bf16.mxu0 %v777_v6  ;;  %785 = vmatprep.subr.bf16.mxu1 %v777_v6 }
  0xdc   :  { %780 = vmatpush1.bf16.msra.mxu0 %v779_v62  ;;  %787 = vmatpush1.bf16.msra.mxu1 %v779_v62  ;;  %v363_v26 = vpop.permute.xlu1 %362 }
  0xdd   :  { %v783_v19 = vpack.c.bf16 %v356_v17, %v354_v15  ;;  %v781_v21 = vpack.c.bf16 %v357_v18, %v355_v16  ;;  %v368_v28 = vrot.slane %v363_v26, %v937_v37 }
  0xdf   :  { %782 = vmatprep.subr.bf16.mxu0 %v781_v21  ;;  %786 = vmatprep.subr.bf16.mxu1 %v781_v21 }
  0xe0   :  { %784 = vmatpush1.bf16.msra.mxu0 %v783_v19  ;;  %788 = vmatpush1.bf16.msra.mxu1 %v783_v19  ;;  %v466_v31 = vpop.permute.xlu1 %465 }
  0xe3   :  { %765 = vmatmul.mubr.msk.f32.vlgmr.msra.gmra.mrb[2].mxu0 %vm369_vm0, %v450_v22  ;;  %766 = vmatmul.mubr.msk.f32.vlgmr.msra.gmra.mrb[0].mxu1 %vm369_vm0, %v451_v23 }
  0xe4   :  { %566 = vmatprep.mubr.f32.mxu1 %v815_v20  ;;  %v476_v59 = vpop.permute.xlu1 %475 }
  0xe7   :  { %767 = vmatmul.mubr.msk.f32.gmra.mrb[2].mxu1 %vm369_vm0, %v452_v24 }
  0xe8   :  { %572 = vmatprep.mubr.f32.mxu1 %v815_v20 }
  0xeb   :  { %768 = vmatmul.mubr.msk.f32.gmra.mrb[4].mxu1 %vm369_vm0, %v453_v25 }
 0x19b   :  { %v439_v30 = vpop.f32.mrb[0].mxu0 }
 0x19c   :  { %v440_v27 = vadd.f32 %v439_v30, %v368_v28  ;;  %v441_v33 = vpop.f32.mrb[1].mxu0 }
 0x19d   :  { %v442_v35 = vadd.f32 %v441_v33, %v368_v28 }
 0x19e   :  { %v444_v34 = vmin.f32 %v440_v27, 15.0 }
 0x19f   :  { %v445_v38 = vmin.f32 %v442_v35, 15.0 }
 0x1a0   :  { %v446_v40 = vmul.f32 1.442695, %v444_v34 }
 0x1a1   :  { %v448_v41 = vmul.f32 1.442695, %v445_v38 }
 0x1a2   :  { %808 = vpow2.f32 %v446_v40 }
 0x1a3   :  { %810 = vpow2.f32 %v448_v41 }
 0x1ac   :  { %v809_v20 = vpop.eup %808 }
 0x1ad   :  { %v811_v42 = vpop.eup %810  ;;  %579 = vxpose.xlu0.b32.start.end [1/1] (short) %v809_v20, 128 }
 0x1ae   :  { %611 = vxpose.xlu1.b32.start.end [1/1] (short) (narrow) %v811_v42, 64 }
 0x1b6   :  { %v556_v32 = vpop.f32.mrb[2].mxu0  ;;  %v562_v44 = vpop.f32.mrb[0].mxu1 }
 0x1b7   :  { %v558_v45 = vpop.f32.mrb[3].mxu0  ;;  %v564_v36 = vpop.f32.mrb[1].mxu1  ;;  %v557_v43 = vadd.f32 %v556_v32, %v461_v50  ;;  %v563_v60 = vadd.f32 %v562_v44, %v466_v31 }
 0x1b8   :  { %v559_v55 = vadd.f32 %v558_v45, %v461_v50  ;;  %v565_v48 = vadd.f32 %v564_v36, %v466_v31 }
 0x1ba   :  { %v568_v46 = vpop.f32.mrb[2].mxu1 }
 0x1bb   :  { %v570_v37 = vpop.f32.mrb[3].mxu1  ;;  %v569_v63 = vadd.f32 %v568_v46, %v471_v57 }
 0x1bc   :  { %v571_v58 = vadd.f32 %v570_v37, %v471_v57 }
 0x1be   :  { %v574_v47 = vpop.f32.mrb[4].mxu1 }
 0x1bf   :  { %v576_v49 = vpop.f32.mrb[5].mxu1  ;;  %v575_v0 = vadd.f32 %v574_v47, %v476_v59 }
 0x1c0   :  { %v577_v39 = vadd.f32 %v576_v49, %v476_v59 }
 0x1cb   :  { %700 = vxpose.xlu1.b32.start [1/4] (short) (narrow) %v559_v55, 64 }
 0x1cf   :  { %701 = vxpose.xlu1.b32.cont [2/4] (short) (narrow) %v565_v48, 64 }
 0x1d3   :  { %702 = vxpose.xlu1.b32.cont [3/4] (short) (narrow) %v571_v58, 64 }
 0x1d7   :  { %703 = vxpose.xlu1.b32.end [4/4] (short) (narrow) %v577_v39, 64 }
 0x1ea   :  { %668 = vxpose.xlu0.b32.start [1/4] (short) %v557_v43, 128 }
 0x1ee   :  { %669 = vxpose.xlu0.b32.cont [2/4] (short) %v563_v60, 128 }
 0x1f2   :  { %670 = vxpose.xlu0.b32.cont [3/4] (short) %v569_v63, 128 }
 0x1f6   :  { %671 = vxpose.xlu0.b32.end [4/4] (short) %v575_v0, 128 }
 0x22d   :  { %v595_v51 = vpop.trf.xlu0 }
 0x22e   :  { %644 = vst.msk [vmem:[%s1242_s7] sm:$0xff] %vm643_vm1, %v595_v51  ;;  %v627_v1 = vpop.trf.xlu1 }
 0x22f   :  { %660 = vst.msk [vmem:[%s1242_s7 + $0x80] sm:$0xff] %vm643_vm1, %v627_v1 }
 0x231   :  { %v596_v52 = vpop.trf.xlu0 }
 0x232   :  { %645 = vst.msk [vmem:[%s1242_s7 + $0x8] sm:$0xff] %vm643_vm1, %v596_v52  ;;  %v628_v2 = vpop.trf.xlu1 }
 0x233   :  { %661 = vst.msk [vmem:[%s1242_s7 + $0x88] sm:$0xff] %vm643_vm1, %v628_v2 }
 0x235   :  { %v597_v3 = vpop.trf.xlu0 }
 0x236   :  { %646 = vst.msk [vmem:[%s1242_s7 + $0x10] sm:$0xff] %vm643_vm1, %v597_v3  ;;  %v629_v4 = vpop.trf.xlu1 }
 0x237   :  { %662 = vst.msk [vmem:[%s1242_s7 + $0x90] sm:$0xff] %vm643_vm1, %v629_v4 }
 0x239   :  { %v598_v5 = vpop.trf.xlu0 }
 0x23a   :  { %647 = vst.msk [vmem:[%s1242_s7 + $0x18] sm:$0xff] %vm643_vm1, %v598_v5  ;;  %v630_v29 = vpop.trf.xlu1 }
 0x23b   :  { %663 = vst.msk [vmem:[%s1242_s7 + $0x98] sm:$0xff] %vm643_vm1, %v630_v29 }
 0x23d   :  { %v599_v53 = vpop.trf.xlu0 }
 0x23e   :  { %648 = vst.msk [vmem:[%s1242_s7 + $0x20] sm:$0xff] %vm643_vm1, %v599_v53  ;;  %v631_v7 = vpop.trf.xlu1 }
 0x23f   :  { %664 = vst.msk [vmem:[%s1242_s7 + $0xa0] sm:$0xff] %vm643_vm1, %v631_v7 }
 0x241   :  { %v600_v54 = vpop.trf.xlu0 }
 0x242   :  { %649 = vst.msk [vmem:[%s1242_s7 + $0x28] sm:$0xff] %vm643_vm1, %v600_v54  ;;  %v632_v8 = vpop.trf.xlu1 }
 0x243   :  { %665 = vst.msk [vmem:[%s1242_s7 + $0xa8] sm:$0xff] %vm643_vm1, %v632_v8 }
 0x245   :  { %v601_v9 = vpop.trf.xlu0 }
 0x246   :  { %650 = vst.msk [vmem:[%s1242_s7 + $0x30] sm:$0xff] %vm643_vm1, %v601_v9  ;;  %v633_v10 = vpop.trf.xlu1 }
 0x247   :  { %666 = vst.msk [vmem:[%s1242_s7 + $0xb0] sm:$0xff] %vm643_vm1, %v633_v10 }
 0x249   :  { %v602_v11 = vpop.trf.xlu0 }
 0x24a   :  { %651 = vst.msk [vmem:[%s1242_s7 + $0x38] sm:$0xff] %vm643_vm1, %v602_v11  ;;  %v634_v56 = vpop.trf.xlu1 }
 0x24b   :  { %667 = vst.msk [vmem:[%s1242_s7 + $0xb8] sm:$0xff] %vm643_vm1, %v634_v56 }
 0x24d   :  { %v603_v61 = vpop.trf.xlu0 }
 0x24e   :  { %652 = vst.msk [vmem:[%s1242_s7 + $0x40] sm:$0xff] %vm643_vm1, %v603_v61  ;;  %v716_v12 = vpop.trf.xlu1 }
 0x24f   :  { %748 = vst.msk [vmem:[%s1243_s8 + $0x80] sm:$0xff] %vm369_vm0, %v716_v12 }
 0x251   :  { %v604_v62 = vpop.trf.xlu0 }
 0x252   :  { %653 = vst.msk [vmem:[%s1242_s7 + $0x48] sm:$0xff] %vm643_vm1, %v604_v62  ;;  %v717_v13 = vpop.trf.xlu1 }
 0x253   :  { %749 = vst.msk [vmem:[%s1243_s8 + $0x88] sm:$0xff] %vm369_vm0, %v717_v13 }
 0x255   :  { %v605_v14 = vpop.trf.xlu0 }
 0x256   :  { %654 = vst.msk [vmem:[%s1242_s7 + $0x50] sm:$0xff] %vm643_vm1, %v605_v14  ;;  %v718_v6 = vpop.trf.xlu1 }
 0x257   :  { %750 = vst.msk [vmem:[%s1243_s8 + $0x90] sm:$0xff] %vm369_vm0, %v718_v6 }
 0x259   :  { %v606_v15 = vpop.trf.xlu0 }
 0x25a   :  { %655 = vst.msk [vmem:[%s1242_s7 + $0x58] sm:$0xff] %vm643_vm1, %v606_v15  ;;  %v719_v16 = vpop.trf.xlu1 }
 0x25b   :  { %751 = vst.msk [vmem:[%s1243_s8 + $0x98] sm:$0xff] %vm369_vm0, %v719_v16 }
 0x25d   :  { %v607_v17 = vpop.trf.xlu0 }
 0x25e   :  { %656 = vst.msk [vmem:[%s1242_s7 + $0x60] sm:$0xff] %vm643_vm1, %v607_v17  ;;  %v720_v18 = vpop.trf.xlu1 }
 0x25f   :  { %752 = vst.msk [vmem:[%s1243_s8 + $0xa0] sm:$0xff] %vm369_vm0, %v720_v18 }
 0x261   :  { %v608_v19 = vpop.trf.xlu0 }
 0x262   :  { %657 = vst.msk [vmem:[%s1242_s7 + $0x68] sm:$0xff] %vm643_vm1, %v608_v19  ;;  %v721_v21 = vpop.trf.xlu1 }
 0x263   :  { %753 = vst.msk [vmem:[%s1243_s8 + $0xa8] sm:$0xff] %vm369_vm0, %v721_v21 }
 0x265   :  { %v609_v22 = vpop.trf.xlu0 }
 0x266   :  { %658 = vst.msk [vmem:[%s1242_s7 + $0x70] sm:$0xff] %vm643_vm1, %v609_v22  ;;  %v722_v23 = vpop.trf.xlu1 }
 0x267   :  { %754 = vst.msk [vmem:[%s1243_s8 + $0xb0] sm:$0xff] %vm369_vm0, %v722_v23 }
 0x269   :  { %v610_v24 = vpop.trf.xlu0 }
 0x26a   :  { %659 = vst.msk [vmem:[%s1242_s7 + $0x78] sm:$0xff] %vm643_vm1, %v610_v24  ;;  %v723_v25 = vpop.trf.xlu1 }
 0x26b   :  { %755 = vst.msk [vmem:[%s1243_s8 + $0xb8] sm:$0xff] %vm369_vm0, %v723_v25 }
 0x26d   :  { %v684_v26 = vpop.trf.xlu0 }
 0x26e   :  { %732 = vst.msk [vmem:[%s1243_s8] sm:$0xff] %vm369_vm0, %v684_v26 }
 0x271   :  { %v685_v28 = vpop.trf.xlu0 }
 0x272   :  { %733 = vst.msk [vmem:[%s1243_s8 + $0x8] sm:$0xff] %vm369_vm0, %v685_v28 }
 0x275   :  { %v686_v30 = vpop.trf.xlu0 }
 0x276   :  { %734 = vst.msk [vmem:[%s1243_s8 + $0x10] sm:$0xff] %vm369_vm0, %v686_v30 }
 0x279   :  { %v687_v27 = vpop.trf.xlu0 }
 0x27a   :  { %735 = vst.msk [vmem:[%s1243_s8 + $0x18] sm:$0xff] %vm369_vm0, %v687_v27 }
 0x27d   :  { %v688_v33 = vpop.trf.xlu0 }
 0x27e   :  { %736 = vst.msk [vmem:[%s1243_s8 + $0x20] sm:$0xff] %vm369_vm0, %v688_v33 }
 0x281   :  { %v689_v35 = vpop.trf.xlu0 }
 0x282   :  { %737 = vst.msk [vmem:[%s1243_s8 + $0x28] sm:$0xff] %vm369_vm0, %v689_v35 }
 0x285   :  { %v690_v34 = vpop.trf.xlu0 }
 0x286   :  { %738 = vst.msk [vmem:[%s1243_s8 + $0x30] sm:$0xff] %vm369_vm0, %v690_v34 }
 0x289   :  { %v691_v38 = vpop.trf.xlu0 }
 0x28a   :  { %739 = vst.msk [vmem:[%s1243_s8 + $0x38] sm:$0xff] %vm369_vm0, %v691_v38 }
 0x28d   :  { %v692_v40 = vpop.trf.xlu0 }
 0x28e   :  { %740 = vst.msk [vmem:[%s1243_s8 + $0x40] sm:$0xff] %vm369_vm0, %v692_v40 }
 0x291   :  { %v693_v41 = vpop.trf.xlu0 }
 0x292   :  { %741 = vst.msk [vmem:[%s1243_s8 + $0x48] sm:$0xff] %vm369_vm0, %v693_v41 }
 0x295   :  { %v694_v20 = vpop.trf.xlu0 }
 0x296   :  { %742 = vst.msk [vmem:[%s1243_s8 + $0x50] sm:$0xff] %vm369_vm0, %v694_v20 }
 0x299   :  { %v695_v42 = vpop.trf.xlu0 }
 0x29a   :  { %743 = vst.msk [vmem:[%s1243_s8 + $0x58] sm:$0xff] %vm369_vm0, %v695_v42 }
 0x29d   :  { %v696_v32 = vpop.trf.xlu0 }
 0x29e   :  { %744 = vst.msk [vmem:[%s1243_s8 + $0x60] sm:$0xff] %vm369_vm0, %v696_v32 }
 0x2a1   :  { %v697_v44 = vpop.trf.xlu0 }
 0x2a2   :  { %745 = vst.msk [vmem:[%s1243_s8 + $0x68] sm:$0xff] %vm369_vm0, %v697_v44 }
 0x2a5   :  { %v698_v45 = vpop.trf.xlu0 }
 0x2a6   :  { %746 = vst.msk [vmem:[%s1243_s8 + $0x70] sm:$0xff] %vm369_vm0, %v698_v45 }
 0x2a9   :  { %v699_v36 = vpop.trf.xlu0 }
 0x2aa   :  { %747 = vst.msk [vmem:[%s1243_s8 + $0x78] sm:$0xff] %vm369_vm0, %v699_v36 }

</bundles_post_ra>
